<compile_context>
chip_gen: v7x
topology: tpu7x:2x2x1
jax: 0.10.0
libtpu: 0.0.40
codegen_flags: <defaults>
</compile_context>

<pallas_src>
import math

import jax
import jax.numpy as jnp
from jax.experimental import pallas as pl
from jax.experimental.pallas import tpu as pltpu


def _round_up(x, m):
    return (x + m - 1) // m * m


def _intermediate_kernel(x_ref, w_ref, b_ref, o_ref, acc_ref):
    # x_ref: (tm, tk), w_ref: (tn, tk)  [PyTorch (I, H) layout], b_ref: (1, tn)
    # o_ref: (tm, tn), acc_ref: (tm, tn) f32 scratch resident across the k axis.
    k = pl.program_id(2)

    @pl.when(k == 0)
    def _():
        acc_ref[...] = jnp.zeros_like(acc_ref)

    # Contract the shared hidden (tk) dim: (tm, tk) x (tn, tk) -> (tm, tn).
    acc_ref[...] += jax.lax.dot_general(
        x_ref[...],
        w_ref[...],
        dimension_numbers=(((1,), (1,)), ((), ())),
        preferred_element_type=jnp.float32,
    )

    @pl.when(k == pl.num_programs(2) - 1)
    def _():
        h = acc_ref[...] + b_ref[...]          # bias is already f32
        # exact erf-based GELU, matching the PyTorch reference
        g = h * 0.5 * (1.0 + jax.lax.erf(h * (1.0 / math.sqrt(2.0))))
        o_ref[...] = g.astype(o_ref.dtype)


def _pick_tile(tile, dim, align):
    """Pick a hardware-aligned tile and the padded dim it divides."""
    if dim <= tile:
        return dim, dim                      # full-dim block, no padding
    t = max(align, (tile // align) * align)  # align the tile
    return t, _round_up(dim, t)


def transformer_intermediate(hidden_states, weight, bias, *,
                             tm=256, tn=512, tk=512, compute_dtype=None):
    """hidden_states: [B, S, H]; weight: [I, H] (PyTorch layout); bias: [I]."""
    B, S, H = hidden_states.shape
    I = weight.shape[0]
    M = B * S
    out_dtype = hidden_states.dtype
    if compute_dtype is None:
        compute_dtype = hidden_states.dtype

    # Tile sizes clamped to the problem; pad dims to tile multiples if needed.
    tm, Mp = _pick_tile(tm, M, 8)
    tn, Ip = _pick_tile(tn, I, 128)
    tk, Hp = _pick_tile(tk, H, 128)

    x2d = hidden_states.reshape(M, H)
    if (Mp, Hp) != (M, H):
        x2d = jnp.pad(x2d, ((0, Mp - M), (0, Hp - H)))
    w = weight
    if (Ip, Hp) != (I, H):
        w = jnp.pad(w, ((0, Ip - I), (0, Hp - H)))
    b2d = bias.reshape(1, I).astype(jnp.float32)
    if Ip != I:
        b2d = jnp.pad(b2d, ((0, 0), (0, Ip - I)))

    x2d = x2d.astype(compute_dtype)
    w = w.astype(compute_dtype)

    grid = (Mp // tm, Ip // tn, Hp // tk)

    # VMEM budget: double-buffered streaming inputs + acc + output buffers.
    in_isz = jnp.dtype(compute_dtype).itemsize
    out_isz = jnp.dtype(out_dtype).itemsize
    vmem_need = (2 * (tm * tk + tn * tk) * in_isz
                 + 2 * tn * 4
                 + tm * tn * 4
                 + 2 * tm * tn * out_isz)
    vmem_limit = min(max(2 * vmem_need, 32 * 1024 * 1024), 48 * 1024 * 1024)

    cost = pl.CostEstimate(
        flops=2 * M * H * I,
        transcendentals=M * I,
        bytes_accessed=(M * H * in_isz + I * H * in_isz + I * 4 + M * I * out_isz),
    )

    out = pl.pallas_call(
        _intermediate_kernel,
        out_shape=jax.ShapeDtypeStruct((Mp, Ip), out_dtype),
        grid_spec=pltpu.PrefetchScalarGridSpec(
            num_scalar_prefetch=0,
            grid=grid,
            in_specs=[
                pl.BlockSpec((tm, tk), lambda i, j, k: (i, k)),   # x tile
                pl.BlockSpec((tn, tk), lambda i, j, k: (j, k)),   # W tile (I, H)
                pl.BlockSpec((1, tn), lambda i, j, k: (0, j)),    # bias tile
            ],
            out_specs=pl.BlockSpec((tm, tn), lambda i, j, k: (i, j)),
            scratch_shapes=[pltpu.VMEM((tm, tn), jnp.float32)],
        ),
        compiler_params=pltpu.CompilerParams(
            dimension_semantics=("parallel", "parallel", "arbitrary"),
            vmem_limit_bytes=vmem_limit,
        ),
        cost_estimate=cost,
    )(x2d, w, b2d)

    if (Mp, Ip) != (M, I):
        out = out[:M, :I]
    return out.reshape(B, S, I)


def _reference(hidden_states, weight, bias):
    h = jnp.einsum("bsh,ih->bsi", hidden_states, weight,
                   precision="highest") + bias
    return h * 0.5 * (1.0 + jax.lax.erf(h / math.sqrt(2.0)))


if __name__ == "__main__":
    key = jax.random.PRNGKey(0)
    kx, kw, kb = jax.random.split(key, 3)

    # Small config consistent with the module: hidden_size=32, intermediate_size=128.
    B, S, H, I = 2, 8, 32, 128
    hidden_states = jax.random.normal(kx, (B, S, H), dtype=jnp.float32)
    weight = jax.random.normal(kw, (I, H), dtype=jnp.float32) * 0.02  # PyTorch (I, H)
    bias = jax.random.normal(kb, (I,), dtype=jnp.float32) * 0.02

    out = transformer_intermediate(hidden_states, weight, bias)
    out = jax.block_until_ready(out)
    ref = _reference(hidden_states, weight, bias)
    assert out.shape == (B, S, I)
    assert jnp.allclose(out, ref, atol=1e-5, rtol=1e-5), "mismatch vs reference (small)"

    # Second check exercising the multi-tile (M, I, K) grid + accumulator path.
    B2, S2, H2, I2 = 2, 64, 256, 512
    x2 = jax.random.normal(kx, (B2, S2, H2), dtype=jnp.float32)
    w2 = jax.random.normal(kw, (I2, H2), dtype=jnp.float32) * 0.02
    b2 = jax.random.normal(kb, (I2,), dtype=jnp.float32) * 0.02
    out2 = transformer_intermediate(x2, w2, b2, tm=64, tn=128, tk=128)
    out2 = jax.block_until_ready(out2)
    ref2 = _reference(x2, w2, b2)
    assert jnp.allclose(out2, ref2, atol=1e-4, rtol=1e-4), "mismatch vs reference (tiled)"

    print("KERNEL_OK")
</pallas_src>

<mosaic_0001>
module attributes {stable_mosaic.version = 11 : i64} {
  func.func @_intermediate_kernel(%arg0: i32, %arg1: i32, %arg2: i32, %arg3: memref<16x32xf32, #tpu.memory_space<vmem>>, %arg4: memref<128x32xf32, #tpu.memory_space<vmem>>, %arg5: memref<1x128xf32, #tpu.memory_space<vmem>>, %arg6: memref<16x128xf32, #tpu.memory_space<vmem>>, %arg7: memref<16x128xf32, #tpu.memory_space<vmem>>) attributes {dimension_semantics = [#tpu.dimension_semantics<parallel>, #tpu.dimension_semantics<parallel>, #tpu.dimension_semantics<arbitrary>], iteration_bounds = array<i64: 1, 1, 1>, scalar_prefetch = 0 : i64, scratch_operands = 1 : i64, tpu.core_type = #tpu.core_type<tc>, window_params = [{transform_indices = @transform_0, window_bounds = array<i64: 16, 32>}, {transform_indices = @transform_1, window_bounds = array<i64: 128, 32>}, {transform_indices = @transform_2, window_bounds = array<i64: 1, 128>}, {transform_indices = @transform_3, window_bounds = array<i64: 16, 128>}]} {
    %c0_i32 = arith.constant 0 : i32
    %0 = arith.cmpi eq, %arg2, %c0_i32 : i32
    %1 = arith.extui %0 : i1 to i32
    %c0_i32_0 = arith.constant 0 : i32
    %2 = arith.cmpi ne, %1, %c0_i32_0 : i32
    scf.if %2 {
      %cst_10 = arith.constant 0.000000e+00 : f32
      %12 = vector.broadcast %cst_10 : f32 to vector<16x128xf32>
      %c0_11 = arith.constant 0 : index
      %c0_12 = arith.constant 0 : index
      %13 = vector.load %arg7[%c0_11, %c0_12] : memref<16x128xf32, #tpu.memory_space<vmem>>, vector<16x128xf32>
      tpu.vector_store %arg7[%c0_11, %c0_12], %12 {strides = array<i32>} : memref<16x128xf32, #tpu.memory_space<vmem>>, vector<16x128xf32>,
    } else {
    }
    %c0 = arith.constant 0 : index
    %c0_1 = arith.constant 0 : index
    %3 = vector.load %arg7[%c0, %c0_1] : memref<16x128xf32, #tpu.memory_space<vmem>>, vector<16x128xf32>
    %c0_2 = arith.constant 0 : index
    %c0_3 = arith.constant 0 : index
    %4 = vector.load %arg3[%c0_2, %c0_3] : memref<16x32xf32, #tpu.memory_space<vmem>>, vector<16x32xf32>
    %c0_4 = arith.constant 0 : index
    %c0_5 = arith.constant 0 : index
    %5 = vector.load %arg4[%c0_4, %c0_5] : memref<128x32xf32, #tpu.memory_space<vmem>>, vector<128x32xf32>
    %cst = arith.constant dense<0.000000e+00> : vector<16x128xf32>
    %6 = tpu.matmul %4, %5, %cst {dimension_numbers = #tpu.dot_dimension_numbers<[1], [1], [0], [0], [0, 0, 1, 0], [], []>} : vector<16x32xf32>, vector<128x32xf32>, vector<16x128xf32> -> vector<16x128xf32>
    %7 = arith.addf %3, %6 : vector<16x128xf32>
    %c0_6 = arith.constant 0 : index
    %c0_7 = arith.constant 0 : index
    %8 = vector.load %arg7[%c0_6, %c0_7] : memref<16x128xf32, #tpu.memory_space<vmem>>, vector<16x128xf32>
    tpu.vector_store %arg7[%c0_6, %c0_7], %7 {strides = array<i32>} : memref<16x128xf32, #tpu.memory_space<vmem>>, vector<16x128xf32>,
    %c0_i32_8 = arith.constant 0 : i32
    %9 = arith.cmpi eq, %arg2, %c0_i32_8 : i32
    %10 = arith.extui %9 : i1 to i32
    %c0_i32_9 = arith.constant 0 : i32
    %11 = arith.cmpi ne, %10, %c0_i32_9 : i32
    scf.if %11 {
      %c0_10 = arith.constant 0 : index
      %c0_11 = arith.constant 0 : index
      %12 = vector.load %arg7[%c0_10, %c0_11] : memref<16x128xf32, #tpu.memory_space<vmem>>, vector<16x128xf32>
      %c0_12 = arith.constant 0 : index
      %c0_13 = arith.constant 0 : index
      %13 = vector.load %arg5[%c0_12, %c0_13] : memref<1x128xf32, #tpu.memory_space<vmem>>, vector<1x128xf32>
      %14 = vector.broadcast %13 : vector<1x128xf32> to vector<16x128xf32>
      %15 = arith.addf %12, %14 : vector<16x128xf32>
      %cst_14 = arith.constant 5.000000e-01 : f32
      %16 = vector.broadcast %cst_14 : f32 to vector<16x128xf32>
      %17 = arith.mulf %15, %16 : vector<16x128xf32>
      %cst_15 = arith.constant 0.707106769 : f32
      %18 = vector.broadcast %cst_15 : f32 to vector<16x128xf32>
      %19 = arith.mulf %15, %18 : vector<16x128xf32>
      %20 = math.erf %19 : vector<16x128xf32>
      %cst_16 = arith.constant 1.000000e+00 : f32
      %21 = vector.broadcast %cst_16 : f32 to vector<16x128xf32>
      %22 = arith.addf %21, %20 : vector<16x128xf32>
      %23 = arith.mulf %17, %22 : vector<16x128xf32>
      %c0_17 = arith.constant 0 : index
      %c0_18 = arith.constant 0 : index
      %24 = vector.load %arg6[%c0_17, %c0_18] : memref<16x128xf32, #tpu.memory_space<vmem>>, vector<16x128xf32>
      tpu.vector_store %arg6[%c0_17, %c0_18], %23 {strides = array<i32>} : memref<16x128xf32, #tpu.memory_space<vmem>>, vector<16x128xf32>,
    } else {
    }
    return
  }
  func.func @transform_0(%arg0: i32, %arg1: i32, %arg2: i32) -> (i32, i32) {
    %c0_i32 = arith.constant 0 : i32
    return %arg0, %arg2 : i32, i32
  }
  func.func @transform_1(%arg0: i32, %arg1: i32, %arg2: i32) -> (i32, i32) {
    %c0_i32 = arith.constant 0 : i32
    return %arg1, %arg2 : i32, i32
  }
  func.func @transform_2(%arg0: i32, %arg1: i32, %arg2: i32) -> (i32, i32) {
    %c0_i32 = arith.constant 0 : i32
    %c0_i32_0 = arith.constant 0 : i32
    return %c0_i32, %arg1 : i32, i32
  }
  func.func @transform_3(%arg0: i32, %arg1: i32, %arg2: i32) -> (i32, i32) {
    %c0_i32 = arith.constant 0 : i32
    return %arg0, %arg1 : i32, i32
  }
}

</mosaic_0001>

<bundles_post_ra>
// kernel: tpu_custom_call.1
= control target key start
LH: loop header
LB: loop body
LE: loop exit
PB: predicated region body
PF: predicated region fallthrough
CT: control target
= control target key end

     0   :  { %vm41_vm0 = vcmask 261120   ;;  %s500_s0 = inlined_call_operand.vmem [shape: f32[16,32], index: 0, kind: input, shape index: {}]   ;;  %s501_s1 = inlined_call_operand.vmem [shape: f32[128,32], index: 1, kind: input, shape index: {}]   ;;  %s502_s2 = inlined_call_operand.vmem [shape: f32[1,128], index: 2, kind: input, shape index: {}]   ;;  %s503_s3 = inlined_call_operand.hbm [shape: f32[16,128], index: 3, kind: output, shape index: {}]  }
   0x1   :  { %v25_v0 = vld [vmem:[%s501_s1] sm:$0xff]  ;;  %v26_v1 = vld [vmem:[%s501_s1 + $0x8] sm:$0xff]  ;;  %v27_v2 = vld [vmem:[%s501_s1 + $0x10] sm:$0xff] }
   0x2   :  { %v289_v3 = vpack.c.bf16 %v26_v1, %v25_v0  ;;  %vm402_vm1 = vmpackc.low %vm41_vm0, %vm41_vm0  ;;  %v28_v5 = vld [vmem:[%s501_s1 + $0x18] sm:$0xff]  ;;  %v23_v7 = vld [vmem:[%s500_s0] sm:$0xff] }
   0x3   :  { %v295_v6 = vpack.c.bf16 %v28_v5, %v27_v2  ;;  %v29_v8 = vld [vmem:[%s501_s1 + $0x20] sm:$0xff]  ;;  %v30_v9 = vld [vmem:[%s501_s1 + $0x28] sm:$0xff]  ;;  %286 = vmatprep.mubr.msk.f32.mxu0 %vm41_vm0, %v23_v7 }
   0x4   :  { %291 = vmatprep.subr.msk.bf16.mxu0 %vm402_vm1, %v289_v3 }
   0x5   :  { %294 = vmatpush3.bf16.xpose.msk.msra.mxu0 %vm402_vm1, %v289_v3 }
   0x6   :  { %297 = vmatprep.subr.msk.bf16.mxu0 %vm402_vm1, %v295_v6 }
   0x7   :  { %8 = vsyncpa [#allocation4], 0  ;;  %v301_v10 = vpack.c.bf16 %v30_v9, %v29_v8  ;;  %v31_v11 = vld [vmem:[%s501_s1 + $0x30] sm:$0xff]  ;;  %v32_v12 = vld [vmem:[%s501_s1 + $0x38] sm:$0xff] }
   0x8   :  { %v307_v13 = vpack.c.bf16 %v32_v12, %v31_v11  ;;  %v33_v14 = vld [vmem:[%s501_s1 + $0x40] sm:$0xff]  ;;  %v34_v15 = vld [vmem:[%s501_s1 + $0x48] sm:$0xff]  ;;  %v35_v17 = vld [vmem:[%s501_s1 + $0x50] sm:$0xff] }
   0x9   :  { %v313_v16 = vpack.c.bf16 %v34_v15, %v33_v14  ;;  %v36_v18 = vld [vmem:[%s501_s1 + $0x58] sm:$0xff]  ;;  %v37_v20 = vld [vmem:[%s501_s1 + $0x60] sm:$0xff]  ;;  %v38_v21 = vld [vmem:[%s501_s1 + $0x68] sm:$0xff] }
   0xa   :  { %v319_v19 = vpack.c.bf16 %v36_v18, %v35_v17  ;;  %v325_v22 = vpack.c.bf16 %v38_v21, %v37_v20  ;;  %v39_v23 = vld [vmem:[%s501_s1 + $0x70] sm:$0xff]  ;;  %v40_v24 = vld [vmem:[%s501_s1 + $0x78] sm:$0xff]  ;;  %v24_v26 = vld [vmem:[%s500_s0 + $0x8] sm:$0xff]  ;;  %s368_s1 = smov [#allocation3]  }
   0xb   :  { %v331_v25 = vpack.c.bf16 %v40_v24, %v39_v23  ;;  %v235_v27 = vld [vmem:[%s502_s2] ss:$0 sm:$0xff]  ;;  %s206_s23 = sshll.u32 %s368_s1, 4  ;;  %s207_s23 = int_to_ptr.vmem [resolvable:$true] %s206_s23 }
   0xc   :  { %s344_s0 = scalar_lea.vmem %s207_s23, 256  ;;  %p349_p1 = scmp.lt.s32.totalorder %s207_s23, %s207_s23 }
   0xd   :  { %300 = vmatpush3.bf16.xpose.msk.msra.mxu0 %vm402_vm1, %v295_v6  ;;  %p345_p0 = scmp.ne.s32.totalorder %s207_s23, %s344_s0  ;;  %p350_p2 = scmp.lt.s32.totalorder %s344_s0, %s344_s0 }
   0xe   :  { %303 = vmatprep.subr.msk.bf16.mxu0 %vm402_vm1, %v301_v10 }
   0xf   :  { %p351_p3 = por %p350_p2, %p349_p1 }
  0x11   :  { %p352_p4 = pnand %p351_p3, %p345_p0 }
  0x15   :  { %306 = vmatpush3.bf16.xpose.msk.msra.mxu0 %vm402_vm1, %v301_v10 }
  0x16   :  { %309 = vmatprep.subr.msk.bf16.mxu0 %vm402_vm1, %v307_v13 }
  0x1d   :  { %312 = vmatpush3.bf16.xpose.msk.msra.mxu0 %vm402_vm1, %v307_v13 }
  0x1e   :  { %315 = vmatprep.subr.msk.bf16.mxu0 %vm402_vm1, %v313_v16 }
  0x25   :  { %318 = vmatpush3.bf16.xpose.msk.msra.mxu0 %vm402_vm1, %v313_v16 }
  0x26   :  { %321 = vmatprep.subr.msk.bf16.mxu0 %vm402_vm1, %v319_v19 }
  0x2d   :  { %324 = vmatpush3.bf16.xpose.msk.msra.mxu0 %vm402_vm1, %v319_v19 }
  0x2e   :  { %327 = vmatprep.subr.msk.bf16.mxu0 %vm402_vm1, %v325_v22 }
  0x35   :  { %330 = vmatpush3.bf16.xpose.msk.msra.mxu0 %vm402_vm1, %v325_v22 }
  0x36   :  { %333 = vmatprep.subr.msk.bf16.mxu0 %vm402_vm1, %v331_v25 }
  0x3d   :  { %336 = vmatpush3.bf16.xpose.msk.msra.mxu0 %vm402_vm1, %v331_v25 }
  0x44   :  { %287 = vmatmul.mubr.msk.f32.vlgmr.msra.gmra.mrb[0].mxu0 %vm41_vm0, %v24_v26 }
 0x117   :  { %v288_v28 = vpop.f32.mrb[0].mxu0 }
 0x118   :  { %v188_v29 = vadd.f32 %v288_v28, %v235_v27  ;;  %v162_v30 = vpop.f32.mrb[1].mxu0 }
 0x119   :  { %v187_v31 = vadd.f32 %v235_v27, %v162_v30 }
 0x11a   :  { %v192_v32 = vmul.f32 0.70710677, %v188_v29  ;;  %v190_v36 = vmul.f32 0.5, %v188_v29 }
 0x11b   :  { %v191_v33 = vmul.f32 0.70710677, %v187_v31  ;;  %v189_v38 = vmul.f32 0.5, %v187_v31 }
 0x11c   :  { %340 = verf.f32 %v192_v32 }
 0x11d   :  { %342 = verf.f32 %v191_v33 }
 0x126   :  { %v341_v34 = vpop.eup %340 }
 0x127   :  { %v343_v35 = vpop.eup %342  ;;  %v196_v37 = vadd.f32 1.0, %v341_v34 }
 0x128   :  { %v195_v39 = vadd.f32 1.0, %v343_v35 }
 0x129   :  { %v198_v40 = vmul.f32 %v196_v37, %v190_v36 }
 0x12a   :  { %v197_v41 = vmul.f32 %v195_v39, %v189_v38 }
 0x12b   :  { %200 = vst [vmem:[#allocation3 + $0x8] sm:$0xff] %v198_v40 }
 0x12c   :  { %199 = vst [vmem:[#allocation3] sm:$0xff] %v197_v41 }
 0x12d   :  { %355 = shalt.err (!%p352_p4)
}
 0x12e   :  { %s356_s25 = scalar_lea.hbm %s503_s3, 256 }
 0x12f   :  { %p357_p5 = scmp.ne.s32.totalorder %s503_s3, %s356_s25  ;;  %p360_p6 = scmp.lt.u32.totalorder %s356_s25, %s503_s3 }
 0x131   :  { %p362_p7 = pnand %p360_p6, %p357_p5 }
 0x133   :  { %365 = shalt.err (!%p362_p7)
}
 0x134   :  { %s369_s30 = smov 128   ;;  %s370_s4 = smov 8  }
 0x135   :  { %212 = dma.vmem_to_hbm [thread:$0]  %s207_s23, 256, %s503_s3, [#allocation4], %s369_s30, %s369_s30, %s370_s4  }
 0x136   :  { %366 = dma.done.wait [#allocation4], 256  }
 0x137   :  { %367 = vsyncadd [#allocation4], 4294967040 }
 0x138   :  { %216 = vsyncpa [#allocation4], 1 }

</bundles_post_ra>
